<compile_context>
chip_gen: v7x
topology: tpu7x:2x2x1
jax: 0.10.0
libtpu: 0.0.40
codegen_flags: <defaults>
</compile_context>

<pallas_src>
import functools

import jax
import jax.numpy as jnp
from jax import lax
from jax.experimental import pallas as pl
from jax.experimental.pallas import tpu as pltpu

EPS = 1e-5


def _round_up(x, m):
    return ((x + m - 1) // m) * m


# ----------------------- BN batch statistics (one fused pass) ----------------

def _bn_stats_kernel(x_ref, sum_ref, sq_ref):
    """Per-batch, per-channel sum and sum-of-squares, accumulated over spatial tiles."""
    @pl.when(pl.program_id(1) == 0)
    def _init():
        sum_ref[...] = jnp.zeros_like(sum_ref)
        sq_ref[...] = jnp.zeros_like(sq_ref)

    xb = x_ref[0].astype(jnp.float32)                     # (Cin, TS)
    sum_ref[...] += jnp.sum(xb, axis=1, keepdims=True)[None]
    sq_ref[...] += jnp.sum(xb * xb, axis=1, keepdims=True)[None]


def _pick_spatial_tile(hw, cin, budget_bytes=8 << 20, max_lanes=32768):
    """Largest multiple-of-128 divisor of hw whose double-buffered tile fits budget."""
    best = None
    d = 128
    while d <= min(hw, max_lanes):
        if hw % d == 0 and 2 * cin * d * 4 <= budget_bytes:
            best = d
        d += 128
    return best if best is not None else hw


# ----------------------- conv tile sizing ------------------------------------

def _conv_vmem_bytes(cin_pad, cout, thw, win_pad, itemsize):
    """Rough per-step VMEM footprint for the fused BN+ReLU+conv kernel."""
    k_pad = 9 * cin_pad
    win = 2 * cin_pad * win_pad * itemsize     # double-buffered input window
    act = 2 * cin_pad * win_pad * 4            # f32 activations + masked copy
    slab = k_pad * thw * 2                     # bf16 im2col value
    out = 2 * cout * thw * 4                   # double-buffered output tile
    wgt = 2 * (cout * k_pad * 2 + cout * 4 + 2 * cin_pad * 4)
    return win + act + slab + out + wgt


def _pick_row_tile(H, W, cin_pad, cout, itemsize,
                   budget_bytes=12 << 20, max_lanes=8192):
    """Largest TH dividing H with TH*W % 128 == 0 that fits the VMEM budget."""
    legal = [th for th in range(1, H + 1)
             if H % th == 0 and (th * W) % 128 == 0]
    if not legal:
        # TODO(synk): no row tile with TH*W % 128 == 0 (e.g. odd W): fall back to a
        # single whole-image tile; very large such images would need a streamed path.
        return H
    best = legal[0]
    for th in legal:                       # ascending -> keep the largest that fits
        thw = th * W
        win_pad = _round_up(thw + 2 * W + 2, 128)
        if thw <= max_lanes and _conv_vmem_bytes(
                cin_pad, cout, thw, win_pad, itemsize) <= budget_bytes:
            best = th
    return best


# ----------------------- fused BN+ReLU+Conv kernel ---------------------------

def _conv_block_kernel(x_hbm, scale_ref, shift_ref, w_ref, b_ref, o_ref,
                       xwin_ref, sem_ref, *, H, W, TH, nH, Cin_pad, WIN_pad):
    """One (batch, row-tile) step.

    x_hbm:     (N, Cin_pad, L_pad)     raw HBM ref (flat, H-padded image)
    scale_ref: (Cin_pad, 1) f32        gamma / sqrt(var + eps)   (0 on padded ch)
    shift_ref: (Cin_pad, 1) f32        beta - mean * scale       (0 on padded ch)
    w_ref:     (Cout, 9*Cin_pad) bf16  3x3 taps, tap-major / channel-minor
    b_ref:     (Cout, 1) f32
    o_ref:     (1, Cout, TH*W) f32     lane-dense output tile
    xwin_ref:  (2, Cin_pad, WIN_pad)   double-buffered halo'd window (input dtype)
    sem_ref:   DMA semaphores, one per slot
    """
    n = pl.program_id(0)
    h = pl.program_id(1)
    THW = TH * W

    def start_fetch(row_tile, slot):
        src = x_hbm.at[n, :, pl.ds(row_tile * THW, WIN_pad)]
        pltpu.make_async_copy(src, xwin_ref.at[slot], sem_ref.at[slot]).start()

    # Manual double buffering confined to this batch element (keeps the batch
    # grid axis megacore-safe under "parallel").
    @pl.when(h == 0)
    def _prime():
        start_fetch(0, 0)

    @pl.when(h + 1 < nH)
    def _prefetch():
        start_fetch(h + 1, (h + 1) % 2)

    slot = h % 2
    pltpu.make_async_copy(x_hbm.at[0, :, pl.ds(0, WIN_pad)],
                          xwin_ref.at[slot], sem_ref.at[slot]).wait()

    win = xwin_ref[slot].astype(jnp.float32)              # (Cin_pad, WIN_pad)

    # BatchNorm (precomputed per-channel scale/shift) + ReLU on the VPU.
    act = jnp.maximum(win * scale_ref[...] + shift_ref[...], 0.0)

    # Conv zero-padding in H (and the flat guard elements): keep only real rows.
    j = lax.broadcasted_iota(jnp.int32, (Cin_pad, WIN_pad), 1)
    pos = h * THW + j - 1                                  # flat padded-image position
    act = jnp.where((pos >= W) & (pos < (H + 1) * W), act, 0.0)

    # im2col: 9 static lane-shifted views -> bf16 slab value (no scratch round
    # trip); column masks implement the conv zero-padding in W.
    tx = lax.broadcasted_iota(jnp.int32, (Cin_pad, THW), 1) % W
    taps = []
    for dy in range(3):
        for dx in range(3):
            off = dy * W + dx
            p = act[:, off:off + THW]                      # (Cin_pad, THW)
            if dx == 0:
                p = jnp.where(tx >= 1, p, 0.0)
            elif dx == 2:
                p = jnp.where(tx <= W - 2, p, 0.0)
            taps.append(p.astype(jnp.bfloat16))
    slab = jnp.concatenate(taps, axis=0)                   # (9*Cin_pad, THW)

    # One MXU matmul over the fused K = 9*Cin_pad contraction, f32 accumulate.
    y = jnp.dot(w_ref[...], slab, preferred_element_type=jnp.float32)
    o_ref[0] = (y + b_ref[...]).astype(o_ref.dtype)


# ----------------------- wrapper ---------------------------------------------

def conv_block_forward(x_nchw, gamma, beta, w_oihw, b):
    # TODO(synk): stride > 1 of the PyTorch module is not implemented (module default
    # stride=1); running-stat (momentum) buffer updates are not emitted.
    N, Cin, H, W = x_nchw.shape
    Cout = w_oihw.shape[0]
    HW = H * W
    in_dtype = x_nchw.dtype
    itemsize = jnp.dtype(in_dtype).itemsize
    x_r3 = x_nchw.reshape(N, Cin, HW)

    # ---- BatchNorm training-mode batch stats: single fused tiled pass ----
    TS = _pick_spatial_tile(HW, Cin)
    S = HW // TS

    sums, sqs = pl.pallas_call(
        _bn_stats_kernel,
        out_shape=(jax.ShapeDtypeStruct((N, Cin, 1), jnp.float32),
                   jax.ShapeDtypeStruct((N, Cin, 1), jnp.float32)),
        grid=(N, S),
        in_specs=[pl.BlockSpec((1, Cin, TS), lambda n, s: (n, 0, s))],
        out_specs=[pl.BlockSpec((1, Cin, 1), lambda n, s: (n, 0, 0)),
                   pl.BlockSpec((1, Cin, 1), lambda n, s: (n, 0, 0))],
        compiler_params=pltpu.CompilerParams(
            dimension_semantics=("parallel", "arbitrary")),
    )(x_r3)

    count = float(N * HW)
    mean = jnp.sum(sums[:, :, 0], axis=0) / count                       # (Cin,)
    var = jnp.maximum(jnp.sum(sqs[:, :, 0], axis=0) / count - mean * mean, 0.0)

    inv_std = 1.0 / jnp.sqrt(var + EPS)
    scale_c = gamma.astype(jnp.float32) * inv_std
    shift_c = beta.astype(jnp.float32) - mean * scale_c

    # ---- Conv: spatial-major layout, halo'd row tiles streamed by manual DMA ----
    Cin_pad = _round_up(Cin, 8)
    TH = _pick_row_tile(H, W, Cin_pad, Cout, itemsize)
    nH = max(H // TH, 1)
    THW = TH * W
    WIN_pad = _round_up(THW + 2 * W + 2, 128)
    L_pad = (nH - 1) * THW + WIN_pad

    # One pad builds the flat image that every window slices into:
    # [1 guard][W zeros (top pad row)][H*W real pixels][W zeros + guard + align],
    # with channels zero-padded to a sublane multiple.  Input dtype is preserved.
    x_flat = jnp.pad(x_r3, ((0, 0), (0, Cin_pad - Cin),
                            (W + 1, L_pad - HW - W - 1)))               # (N,Cin_pad,L_pad)

    scale = jnp.pad(scale_c, (0, Cin_pad - Cin)).reshape(Cin_pad, 1)
    shift = jnp.pad(shift_c, (0, Cin_pad - Cin)).reshape(Cin_pad, 1)

    # Weights -> (Cout, 9*Cin_pad), tap-major / channel-minor, bf16 for the MXU.
    w_t = jnp.transpose(w_oihw, (0, 2, 3, 1)).astype(jnp.float32)       # (Cout,3,3,Cin)
    w_t = jnp.pad(w_t, ((0, 0), (0, 0), (0, 0), (0, Cin_pad - Cin)))
    w2 = w_t.reshape(Cout, 9 * Cin_pad).astype(jnp.bfloat16)
    b2 = b.reshape(Cout, 1).astype(jnp.float32)

    vmem_est = _conv_vmem_bytes(Cin_pad, Cout, THW, WIN_pad, itemsize)
    vmem_limit = int(min(56 << 20, max(32 << 20, 3 * vmem_est)))        # v7x-safe cap

    kernel = functools.partial(_conv_block_kernel, H=H, W=W, TH=TH, nH=nH,
                               Cin_pad=Cin_pad, WIN_pad=WIN_pad)
    out_flat = pl.pallas_call(
        kernel,
        out_shape=jax.ShapeDtypeStruct((N, Cout, HW), jnp.float32),
        grid=(N, nH),
        in_specs=[
            pl.BlockSpec(memory_space=pl.ANY),                  # x_flat stays in HBM
            pl.BlockSpec((Cin_pad, 1), lambda n, h: (0, 0)),
            pl.BlockSpec((Cin_pad, 1), lambda n, h: (0, 0)),
            pl.BlockSpec((Cout, 9 * Cin_pad), lambda n, h: (0, 0)),
            pl.BlockSpec((Cout, 1), lambda n, h: (0, 0)),
        ],
        out_specs=pl.BlockSpec((1, Cout, THW), lambda n, h: (n, 0, h)),
        scratch_shapes=[pltpu.VMEM((2, Cin_pad, WIN_pad), in_dtype),
                        pltpu.SemaphoreType.DMA((2,))],
        compiler_params=pltpu.CompilerParams(
            dimension_semantics=("parallel", "arbitrary"),
            vmem_limit_bytes=vmem_limit),
    )(x_flat, scale, shift, w2, b2)

    return out_flat.reshape(N, Cout, H, W)                               # NCHW


# ----------------------- pure-JAX reference ----------------------------------

def ref_forward(x, gamma, beta, w, b):
    mean = x.mean(axis=(0, 2, 3))
    var = ((x - mean[None, :, None, None]) ** 2).mean(axis=(0, 2, 3))
    xn = (x - mean[None, :, None, None]) / jnp.sqrt(var[None, :, None, None] + EPS)
    xn = xn * gamma[None, :, None, None] + beta[None, :, None, None]
    xn = jnp.maximum(xn, 0.0)
    y = jax.lax.conv_general_dilated(
        xn, w, window_strides=(1, 1), padding=((1, 1), (1, 1)),
        dimension_numbers=("NCHW", "OIHW", "NCHW"),
        precision=jax.lax.Precision.HIGHEST)
    return y + b[None, :, None, None]


if __name__ == "__main__":
    N, Cin, H, W, Cout = 2, 4, 16, 16, 8

    key = jax.random.PRNGKey(0)
    k1, k2, k3, k4, k5 = jax.random.split(key, 5)
    x = jax.random.normal(k1, (N, Cin, H, W), jnp.float32)
    gamma = 1.0 + 0.1 * jax.random.normal(k2, (Cin,), jnp.float32)
    beta = 0.1 * jax.random.normal(k3, (Cin,), jnp.float32)
    w = 0.1 * jax.random.normal(k4, (Cout, Cin, 3, 3), jnp.float32)
    b = 0.1 * jax.random.normal(k5, (Cout,), jnp.float32)

    out = jax.block_until_ready(conv_block_forward(x, gamma, beta, w, b))
    ref = ref_forward(x, gamma, beta, w, b)

    assert out.shape == (N, Cout, H, W), out.shape
    max_err = float(jnp.abs(out - ref).max())
    assert jnp.allclose(out, ref, atol=2e-2, rtol=2e-2), max_err

    print("KERNEL_OK")
</pallas_src>

<mosaic_0001>
module attributes {stable_mosaic.version = 11 : i64} {
  func.func @_bn_stats_kernel(%arg0: i32, %arg1: i32, %arg2: memref<1x4x256xf32, #tpu.memory_space<vmem>>, %arg3: memref<1x4x1xf32, #tpu.memory_space<vmem>>, %arg4: memref<1x4x1xf32, #tpu.memory_space<vmem>>) attributes {dimension_semantics = [#tpu.dimension_semantics<parallel>, #tpu.dimension_semantics<arbitrary>], iteration_bounds = array<i64: 2, 1>, scalar_prefetch = 0 : i64, scratch_operands = 0 : i64, tpu.core_type = #tpu.core_type<tc>, window_params = [{transform_indices = @transform_0, window_bounds = array<i64: 1, 4, 256>}, {transform_indices = @transform_1, window_bounds = array<i64: 1, 4, 1>}, {transform_indices = @transform_2, window_bounds = array<i64: 1, 4, 1>}]} {
    %c0_i32 = arith.constant 0 : i32
    %0 = arith.cmpi eq, %arg1, %c0_i32 : i32
    %1 = arith.extui %0 : i1 to i32
    %c0_i32_0 = arith.constant 0 : i32
    %2 = arith.cmpi ne, %1, %c0_i32_0 : i32
    scf.if %2 {
      %cst_16 = arith.constant 0.000000e+00 : f32
      %18 = vector.broadcast %cst_16 : f32 to vector<1x4x1xf32>
      %c0_17 = arith.constant 0 : index
      %c0_18 = arith.constant 0 : index
      %c0_19 = arith.constant 0 : index
      %19 = vector.load %arg3[%c0_17, %c0_18, %c0_19] : memref<1x4x1xf32, #tpu.memory_space<vmem>>, vector<1x4x1xf32>
      tpu.vector_store %arg3[%c0_17, %c0_18, %c0_19], %18 {strides = array<i32>} : memref<1x4x1xf32, #tpu.memory_space<vmem>>, vector<1x4x1xf32>,
      %cst_20 = arith.constant 0.000000e+00 : f32
      %20 = vector.broadcast %cst_20 : f32 to vector<1x4x1xf32>
      %c0_21 = arith.constant 0 : index
      %c0_22 = arith.constant 0 : index
      %c0_23 = arith.constant 0 : index
      %21 = vector.load %arg4[%c0_21, %c0_22, %c0_23] : memref<1x4x1xf32, #tpu.memory_space<vmem>>, vector<1x4x1xf32>
      tpu.vector_store %arg4[%c0_21, %c0_22, %c0_23], %20 {strides = array<i32>} : memref<1x4x1xf32, #tpu.memory_space<vmem>>, vector<1x4x1xf32>,
    } else {
    }
    %c0 = arith.constant 0 : index
    %c0_1 = arith.constant 0 : index
    %c0_2 = arith.constant 0 : index
    %3 = vector.load %arg2[%c0, %c0_1, %c0_2] : memref<1x4x256xf32, #tpu.memory_space<vmem>>, vector<1x4x256xf32>
    %4 = vector.shape_cast %3 : vector<1x4x256xf32> to vector<4x256xf32>
    %c0_3 = arith.constant 0 : index
    %c0_4 = arith.constant 0 : index
    %c0_5 = arith.constant 0 : index
    %5 = vector.load %arg3[%c0_3, %c0_4, %c0_5] : memref<1x4x1xf32, #tpu.memory_space<vmem>>, vector<1x4x1xf32>
    %cst = arith.constant dense<0.000000e+00> : vector<4xf32>
    %6 = vector.multi_reduction <add>, %4, %cst [1] : vector<4x256xf32> to vector<4xf32>
    %7 = vector.shape_cast %6 : vector<4xf32> to vector<4x1xf32>
    %8 = vector.shape_cast %7 : vector<4x1xf32> to vector<1x4x1xf32>
    %9 = arith.addf %5, %8 : vector<1x4x1xf32>
    %c0_6 = arith.constant 0 : index
    %c0_7 = arith.constant 0 : index
    %c0_8 = arith.constant 0 : index
    %10 = vector.load %arg3[%c0_6, %c0_7, %c0_8] : memref<1x4x1xf32, #tpu.memory_space<vmem>>, vector<1x4x1xf32>
    tpu.vector_store %arg3[%c0_6, %c0_7, %c0_8], %9 {strides = array<i32>} : memref<1x4x1xf32, #tpu.memory_space<vmem>>, vector<1x4x1xf32>,
    %c0_9 = arith.constant 0 : index
    %c0_10 = arith.constant 0 : index
    %c0_11 = arith.constant 0 : index
    %11 = vector.load %arg4[%c0_9, %c0_10, %c0_11] : memref<1x4x1xf32, #tpu.memory_space<vmem>>, vector<1x4x1xf32>
    %12 = arith.mulf %4, %4 : vector<4x256xf32>
    %cst_12 = arith.constant dense<0.000000e+00> : vector<4xf32>
    %13 = vector.multi_reduction <add>, %12, %cst_12 [1] : vector<4x256xf32> to vector<4xf32>
    %14 = vector.shape_cast %13 : vector<4xf32> to vector<4x1xf32>
    %15 = vector.shape_cast %14 : vector<4x1xf32> to vector<1x4x1xf32>
    %16 = arith.addf %11, %15 : vector<1x4x1xf32>
    %c0_13 = arith.constant 0 : index
    %c0_14 = arith.constant 0 : index
    %c0_15 = arith.constant 0 : index
    %17 = vector.load %arg4[%c0_13, %c0_14, %c0_15] : memref<1x4x1xf32, #tpu.memory_space<vmem>>, vector<1x4x1xf32>
    tpu.vector_store %arg4[%c0_13, %c0_14, %c0_15], %16 {strides = array<i32>} : memref<1x4x1xf32, #tpu.memory_space<vmem>>, vector<1x4x1xf32>,
    return
  }
  func.func @transform_0(%arg0: i32, %arg1: i32) -> (i32, i32, i32) {
    %c0_i32 = arith.constant 0 : i32
    %c0_i32_0 = arith.constant 0 : i32
    return %arg0, %c0_i32, %arg1 : i32, i32, i32
  }
  func.func @transform_1(%arg0: i32, %arg1: i32) -> (i32, i32, i32) {
    %c0_i32 = arith.constant 0 : i32
    %c0_i32_0 = arith.constant 0 : i32
    %c0_i32_1 = arith.constant 0 : i32
    return %arg0, %c0_i32, %c0_i32_0 : i32, i32, i32
  }
  func.func @transform_2(%arg0: i32, %arg1: i32) -> (i32, i32, i32) {
    %c0_i32 = arith.constant 0 : i32
    %c0_i32_0 = arith.constant 0 : i32
    %c0_i32_1 = arith.constant 0 : i32
    return %arg0, %c0_i32, %c0_i32_0 : i32, i32, i32
  }
}

</mosaic_0001>

<bundles_post_ra>
// kernel: tpu_custom_call.1
= control target key start
LH: loop header
LB: loop body
LE: loop exit
PB: predicated region body
PF: predicated region fallthrough
CT: control target
= control target key end

     0   :  { %8 = vsyncpa [#allocation3], 0  ;;  %s630_s0 = inlined_call_operand.hbm [shape: f32[2,4,256], index: 0, kind: input, shape index: {}]   ;;  %s631_s1 = inlined_call_operand.vmem [shape: f32[2,4,1], index: 1, kind: output, shape index: {0}]   ;;  %s632_s2 = inlined_call_operand.vmem [shape: f32[2,4,1], index: 2, kind: output, shape index: {1}]  }
   0x1   :  { %10 = vsyncpa [#allocation3 + $0x1], 0  ;;  %s498_s9 = smov 0   ;;  %s500_s10 = smov 0  }
   0x2   :  { %s502_s11 = smov 0   ;;  %s504_s12 = smov 0  }
   0x3   :  { %s506_s13 = smov 0   ;;  %s508_s14 = smov 0  }
   0x4 LB: > { %s328_s15 = sadd.s32 4294967295, %s479_s14   ;;  %s28_s16 = sadd.s32 1, %s475_s13  ;;  %s479_s14 = sphi %s508_s14, %s16_s14   ;;  %s475_s13 = sphi %s506_s13, %s642_s13   ;;  %s471_s12 = sphi %s504_s12, %s641_s12   ;;  %s467_s11 = sphi %s502_s11, %s640_s11   ;;  %s463_s10 = sphi %s500_s10, %s639_s10   ;;  %s459_s9 = sphi %s498_s9, %s638_s9  }
   0x5   : > { %p30_p0 = scmp.ge.s32.totalorder %s28_s16, 2  ;;  %s37_s17 = sadd.s32 1, %s467_s11 }
   0x6   : > { %p44_p1 = scmp.ne.s32.totalorder %s467_s11, %s463_s10  ;;  %p45_p2 = scmp.eq.s32.totalorder %s479_s14, 0 }
   0x7   : > { %s644_s16 = smov (%p30_p0, %s28_s16), 0  ;;  %p50_p4 = scmp.ne.s32.totalorder %s463_s10, %s459_s9 }
   0x8   : > { %p534_p3 = por %p45_p2, %p44_p1  ;;  %s32_s19 = ssub.s32 %s475_s13, %s644_s16 }
   0x9   : > { %p51_p5 = scmp.eq.s32.totalorder %s328_s15, 0  ;;  %p35_p6 = scmp.eq.s32.totalorder %s32_s19, 0 }
   0xa   : > { %p348_p8 = scmp.lt.s32.totalorder %s479_s14, 2  ;;  %s126_s22 = sand.u32 1, %s467_s11  }
   0xb   : > { %p541_p7 = por %p51_p5, %p50_p4  ;;  %s341_s23 = sshll.u32 %s475_s13, 7 }
   0xc   : > { %s547_s21 = scalar_select %p35_p6, %s467_s11, %s37_s17  }
   0xd   : > { %s332_s24 = sshll.u32 %s126_s22, 3  ;;  %s554_s27 = scalar_lea.hbm %s630_s0, %s341_s23 }
   0xe   : > { %s130_s28 = scalar_lea.vmem [#allocation2], %s332_s24  ;;  %p558_p9 = pnand %p348_p8, %p534_p3 }
   0xf   : > { %s140_s29 = sshll.u32 %s130_s28, 4  ;;  %s127_s3 = scalar_lea.sflag [#allocation3], %s126_s22  ;;  %s562_s29 = int_to_ptr.vmem [resolvable:$true] %s140_s29 }
  0x10   : > { %s399_s4 = scalar_lea.hbm %s554_s27, 128  ;;  %p401_p13 = pneg %p558_p9 }
  0x11   : > { %p400_p12 = scmp.ne.s32.totalorder %s554_s27, %s399_s4  ;;  %s404_s7 = scalar_lea.hbm %s630_s0, 256 }
  0x12   : > { %p405_p2 = scmp.lt.u32.totalorder %s554_s27, %s630_s0  ;;  %p406_p3 = scmp.lt.u32.totalorder %s404_s7, %s399_s4 }
  0x13   : > { %p402_p0 = pnand %p401_p13, %p400_p12  ;;  %p408_p5 = scmp.lt.u32.totalorder %s399_s4, %s554_s27 }
  0x14   : > { %p407_p4 = por %p406_p3, %p405_p2 }
  0x15   : > { %p403_p1 = pneg %p402_p0 }
  0x16   : > { %p409_p6 = por %p408_p5, %p407_p4 }
  0x18   : > { %p410_p8 = pnand %p409_p6, %p403_p1 }
  0x1a   : > { %413 = shalt.err (!%p410_p8)
}
  0x1b   : > { %s414_s15 = scalar_lea.vmem %s562_s29, 128  ;;  %s481_s17 = smov [#allocation2]  }
  0x1c   : > { %p415_p12 = scmp.ne.s32.totalorder %s562_s29, %s414_s15  ;;  %s419_s18 = sshll.u32 %s481_s17, 4  ;;  %s420_s18 = int_to_ptr.vmem [resolvable:$false] %s419_s18 }
  0x1d   : > { %s421_s19 = scalar_lea.vmem %s420_s18, 256  ;;  %p422_p11 = scmp.lt.s32.totalorder %s562_s29, %s420_s18 }
  0x1e   : > { %p417_p0 = pnand %p415_p12, %p401_p13  ;;  %p423_p2 = scmp.lt.s32.totalorder %s421_s19, %s414_s15 }
  0x20   : > { %p418_p10 = pneg %p417_p0  ;;  %p424_p3 = por %p423_p2, %p422_p11 }
  0x22   : > { %p425_p4 = pnand %p424_p3, %p418_p10 }
  0x24   : > { %428 = shalt.err (!%p425_p4)
}
  0x25   : > { %347 = dma.hbm_to_vmem [thread:$0]  (!%p558_p9), %s554_s27, 128, %s562_s29, %s127_s3  }
  0x26   : > { %p636_p1 = scmp.lt.s32.totalorder %s479_s14, 3  ;;  %p637_p5 = scmp.ge.s32.totalorder %s479_s14, 1 }
  0x28   : > { %p146_p13 = pnand %p637_p5, %p636_p1 }
  0x29   : > { %s151_s22 = sand.u32 (!%p146_p13), 1, %s463_s10  }
  0x2a   : > { %149 = sbr.rel (%p146_p13) target bundleno = 205 (0xcd), region = 24  ;;  %s336_s23 = sshll.u32 (!%p146_p13), %s151_s22, 3 }
  0x2b   : > { %s152_s24 = scalar_lea.sflag (!%p146_p13), [#allocation3], %s151_s22  ;;  %s155_s25 = scalar_lea.vmem (!%p146_p13), [#allocation2], %s336_s23 }
  0x31   : > { %454 = dma.done.wait (%p541_p7), %s152_s24, 128  }
  0x32   : > { %456 = vsyncadd (%p541_p7), %s152_s24, 4294967168  ;;  %p180_p10 = scmp.lt.s32.totalorder %s471_s12, 1  ;;  %vm192_vm0 = vcmask 3072   ;;  %vm200_vm1 = vcmask 1043456   ;;  %v482_v0 = vmov 0.0   ;;  %v195_v1 = vld [vmem:[%s155_s25] sm:$0xff] }
  0x33   : > { %v198_v2 = vcombine.high %v195_v1, %v195_v1  ;;  %v201_v3 = vsel %vm200_vm1, %v195_v1, 0.0  ;;  %v210_v4 = vmul.f32 %v195_v1, %v195_v1 }
  0x34   : > { %s646_s12 = smov (!%p180_p10, %s471_s12), 1 }
  0x35   : > { %s337_s26 = sshll.u32 %s646_s12, 2  ;;  %v202_v5 = vsel %vm200_vm1, %v198_v2, 0.0  ;;  %v212_v6 = vcombine.high %v210_v4, %v210_v4  ;;  %v214_v7 = vsel %vm200_vm1, %v210_v4, 0.0 }
  0x36   : > { %s183_s29 = scalar_lea.vmem %s631_s1, %s337_s26  ;;  %v203_v8 = vadd.f32 %v202_v5, %v201_v3  ;;  %s187_s30 = scalar_lea.vmem %s632_s2, %s337_s26 }
  0x37   : > { %193 = vst.msk [vmem:[%s183_s29] sm:$0xf] %vm192_vm0, %v482_v0  ;;  %v215_v9 = vsel %vm200_vm1, %v212_v6, 0.0  ;;  %194 = vst.msk [vmem:[%s187_s30] sm:$0xf] %vm192_vm0, %v482_v0 }
  0x38   : > { %204 = vadd.xlane.f32.xlu0 %v203_v8  ;;  %v216_v10 = vadd.f32 %v215_v9, %v214_v7 }
  0x3c   : > { %217 = vadd.xlane.f32.xlu0 %v216_v10 }
  0x3e   : > { %v196_v11 = vld [vmem:[%s183_s29] sm:$0xf] }
  0x3f   : > { %v209_v14 = vld [vmem:[%s187_s30] sm:$0xf] }
  0xc5   : > { %v205_v12 = vpop.xlane.xlu0 %204 }
  0xc6   : > { %v206_v13 = vadd.f32 %v205_v12, %v196_v11 }
  0xc8   : > { %208 = vst.msk [vmem:[%s183_s29] sm:$0xf] %vm192_vm0, %v206_v13 }
  0xc9   : > { %v218_v15 = vpop.xlane.xlu0 %217 }
  0xca   : > { %v219_v16 = vadd.f32 %v218_v15, %v209_v14 }
  0xcc   : > { %220 = vst.msk [vmem:[%s187_s30] sm:$0xf] %vm192_vm0, %v219_v16 }
  0xcd PF: > { %s16_s14 = sadd.s32 1, %s479_s14   ;;  %s638_s9 = smov %s463_s10 }
  0xce   : > { %p13_p7 = scmp.ge.s32.totalorder %s16_s14, 4   ;;  %s639_s10 = smov %s467_s11 }
  0xcf   : > { %s640_s11 = smov %s547_s21  ;;  %s641_s12 = smov %s475_s13 }
  0xd0   : > { %s642_s13 = smov %s644_s16  ;;  %15 = sbr.rel (!%p13_p7) target bundleno = 4 (0x4), region = 80 }
  0xd7   :  { %254 = vsyncpa [#allocation3], 1 }
  0xd8   :  { %256 = vsyncpa [#allocation3 + $0x1], 1 }

</bundles_post_ra>
